<compile_context>
chip_gen: v6e
topology: v6e:2x2x1
jax: 0.10.0
libtpu: 0.0.40
codegen_flags: <defaults>
</compile_context>

<pallas_src>
import functools

import jax
import jax.numpy as jnp
from jax.experimental import pallas as pl
from jax.experimental.pallas import tpu as pltpu

KERNEL_SIZE = 25  # typical CDFM moving-average window (must be odd)

# ~2 MiB of input bytes per block (>=85% of measured HBM roofline), capped so the
# in-kernel f32 temporaries stay bounded on v7x's 64 MiB VMEM.
_BLOCK_TARGET_BYTES = 2 << 20
_BLOCK_ELEMS_CAP = 640 * 1024
# Largest flattened row (L*C elements) handled by the lane-dense flat path.
_FLAT_MAX_ELEMS = 768 * 1024
# Hard cap on block elements after legalizing the batch tile (multiple of 8 / full B).
_BLOCK_ELEMS_HARD_CAP = 896 * 1024


def _decomp_flat_kernel(x_ref, res_ref, mean_ref, *, L, C, kernel_size):
    """Blocks are (bb, L*C): time*channels flattened onto the lane axis.

    mean[t] = (1/k) * sum_{j=-pad..pad} x[clip(t+j, 0, L-1)]  (edge-replicated
    AvgPool1d).  Clipped shifts are built iteratively: one forward step maps row
    t -> row min(t+1, L-1), which in the flat layout is "drop the first C lanes,
    re-append the last C lanes", so the boundary fix-up is just a C-wide slice
    and no (L + 2*pad) padded copy is ever materialized.
    """
    bb, F = x_ref.shape
    pad = (kernel_size - 1) // 2
    x = x_ref[...].astype(jnp.float32)

    if pad == 0 or L == 1:
        mean = x  # the window only ever sees (replicas of) the same time step
    else:
        # TODO(synk): switch these lane shifts to pltpu.roll + a row mask (XLU
        # slot, per the v7x review item) once non-128-multiple row widths are
        # confirmed supported by the rotate lowering.
        acc = x
        fwd = x
        bwd = x
        for _ in range(pad):
            fwd = jnp.concatenate([fwd[:, C:], fwd[:, F - C:]], axis=1)  # t -> min(t+1, L-1)
            bwd = jnp.concatenate([bwd[:, :C], bwd[:, :F - C]], axis=1)  # t -> max(t-1, 0)
            acc = acc + fwd + bwd
        mean = acc * (1.0 / kernel_size)

    mean_ref[...] = mean.astype(mean_ref.dtype)
    res_ref[...] = (x - mean).astype(res_ref.dtype)


def _decomp_3d_kernel(x_ref, res_ref, mean_ref, *, kernel_size):
    """Fallback for very large L*C rows: blocks are (bb, L, tc), channels on lanes."""
    bb, L, tc = x_ref.shape
    pad = (kernel_size - 1) // 2
    x = x_ref[...].astype(jnp.float32)

    if pad == 0 or L == 1:
        mean = x
    else:
        front = jnp.broadcast_to(x[:, :1, :], (bb, pad, tc))
        end = jnp.broadcast_to(x[:, L - 1:, :], (bb, pad, tc))
        xpad = jnp.concatenate([front, x, end], axis=1)  # (bb, L + 2*pad, tc), VMEM only
        acc = xpad[:, 0:L, :]
        for j in range(1, kernel_size):
            acc = acc + xpad[:, j:j + L, :]
        mean = acc * (1.0 / kernel_size)

    mean_ref[...] = mean.astype(mean_ref.dtype)
    res_ref[...] = (x - mean).astype(res_ref.dtype)


def _vmem_limit_bytes(block_elems, itemsize):
    """Scoped-VMEM request sized from the actual block: x + res + mean double-buffered
    plus a generous bound on the in-kernel f32 temporaries."""
    io = 3 * 2 * block_elems * itemsize
    temps = 8 * block_elems * 4
    need = io + temps + (2 << 20)
    try:
        cap = int(pltpu.get_tpu_info().vmem_capacity_bytes) - (8 << 20)
    except Exception:
        cap = 56 << 20  # safe for v5e/v6e (128 MiB) and v7x (64 MiB) physical VMEM
    return int(max(16 << 20, min(need, cap)))


def series_decomp(x, kernel_size=KERNEL_SIZE, *, max_flat_elems=_FLAT_MAX_ELEMS):
    """Returns (res, moving_mean), matching PyTorch series_decomp.forward for (B, L, C) input."""
    assert x.ndim == 3, "expected (batch, length, channels)"
    assert kernel_size >= 1 and kernel_size % 2 == 1, "kernel_size must be odd"
    B, L, C = x.shape
    F = L * C
    itemsize = jnp.dtype(x.dtype).itemsize
    block_elems = min(_BLOCK_TARGET_BYTES // itemsize, _BLOCK_ELEMS_CAP)

    cost = pl.CostEstimate(
        flops=kernel_size * B * L * C,
        transcendentals=0,
        bytes_accessed=3 * B * L * C * itemsize,
    )

    # ---- lane-dense flat path: block last dim == L*C ----
    use_flat = F <= max_flat_elems
    if use_flat:
        bb = max(1, min(B, block_elems // max(F, 1)))
        if B > 1:
            bb = min(bb, pl.cdiv(B, 2))  # keep >=2 grid steps so both v7x TCs get work
        if bb < B:
            # Sublane (second-to-last) block dim must be a multiple of 8 or the full dim.
            bb = B if B <= 8 else max(8, (bb // 8) * 8)
        if bb * F > _BLOCK_ELEMS_HARD_CAP:
            use_flat = False  # the smallest legal batch tile would blow the VMEM budget

    if use_flat:
        grid = (pl.cdiv(B, bb),)
        spec = pl.BlockSpec((bb, F), lambda i: (i, 0))
        kernel = functools.partial(_decomp_flat_kernel, L=L, C=C, kernel_size=kernel_size)
        in_specs = [spec]
        out_specs = (spec, spec)
        dims = ("parallel",)
        x_call = x.reshape(B, F)  # free: merges contiguous minor dims, no transpose
        block_elems_actual = bb * F
    else:
        # ---- 3-D fallback: whole-L blocks, channel tiling ----
        # TODO(synk): tile L with a pad-sized halo for extremely long sequences
        # (a (1, L, 128) block can still exceed the VMEM budget for huge L).
        if C >= 128:
            lanes = 256 if itemsize <= 2 else 128  # >=512 B strided HBM bursts for bf16
            tc = (max(1, block_elems // max(L, 1)) // lanes) * lanes
            tc = max(lanes, min(tc, C))
            if tc >= C:
                tc = C
        else:
            tc = C  # correctness-only path for narrow channels with huge L
        bb = max(1, min(B, block_elems // max(L * tc, 1)))
        if B > 1 and pl.cdiv(C, tc) == 1:
            bb = min(bb, pl.cdiv(B, 2))  # keep >=2 grid steps for v7x
        grid = (pl.cdiv(B, bb), pl.cdiv(C, tc))
        spec = pl.BlockSpec((bb, L, tc), lambda i, j: (i, 0, j))
        kernel = functools.partial(_decomp_3d_kernel, kernel_size=kernel_size)
        in_specs = [spec]
        out_specs = (spec, spec)
        dims = ("parallel", "parallel")
        x_call = x
        block_elems_actual = bb * L * tc

    res, mean = pl.pallas_call(
        kernel,
        out_shape=(
            jax.ShapeDtypeStruct(x_call.shape, x.dtype),
            jax.ShapeDtypeStruct(x_call.shape, x.dtype),
        ),
        grid=grid,
        in_specs=in_specs,
        out_specs=out_specs,
        compiler_params=pltpu.CompilerParams(
            dimension_semantics=dims,
            vmem_limit_bytes=_vmem_limit_bytes(block_elems_actual, itemsize),
        ),
        cost_estimate=cost,
    )(x_call)
    return res.reshape(B, L, C), mean.reshape(B, L, C)


def _reference(x, kernel_size):
    """Pure-JAX mirror of the PyTorch module (f32 accumulation, like the kernel)."""
    pad = (kernel_size - 1) // 2
    xf = x.astype(jnp.float32)
    L = x.shape[1]
    front = jnp.repeat(xf[:, :1, :], pad, axis=1)
    end = jnp.repeat(xf[:, -1:, :], pad, axis=1)
    xpad = jnp.concatenate([front, xf, end], axis=1)
    mean = sum(xpad[:, j:j + L, :] for j in range(kernel_size)) * (1.0 / kernel_size)
    return (xf - mean).astype(x.dtype), mean.astype(x.dtype)


if __name__ == "__main__":
    key = jax.random.PRNGKey(0)
    cases = [
        # (B, L, C, kernel_size, dtype, kwargs)
        (2, 16, 7, 5, jnp.float32, {}),                       # tiny channel count -> flat path
        (2, 24, 21, 25, jnp.float32, {}),                     # typical CDFM window (k=25)
        (9, 16, 8, 5, jnp.float32, {}),                       # B>8 -> 2 grid steps, partial last block
        (1, 8, 4, 3, jnp.float32, {}),                        # single batch row
        (2, 1, 8, 5, jnp.float32, {}),                        # L == 1 edge case
        (2, 16, 16, 5, jnp.bfloat16, {}),                     # low-precision input
        (2, 16, 136, 5, jnp.float32, {"max_flat_elems": 1}),  # force the 3-D fallback path
    ]
    for (B, L, C, k, dtype, kwargs) in cases:
        key, sub = jax.random.split(key)
        x = jax.random.normal(sub, (B, L, C), dtype=jnp.float32).astype(dtype)

        res, mean = series_decomp(x, k, **kwargs)
        jax.block_until_ready((res, mean))

        res_ref, mean_ref = _reference(x, k)
        atol = 1e-5 if dtype == jnp.float32 else 2e-2
        assert jnp.allclose(res.astype(jnp.float32), res_ref.astype(jnp.float32),
                            atol=atol), f"residual mismatch for {(B, L, C, k, dtype)}"
        assert jnp.allclose(mean.astype(jnp.float32), mean_ref.astype(jnp.float32),
                            atol=atol), f"moving_mean mismatch for {(B, L, C, k, dtype)}"
    print("KERNEL_OK")
</pallas_src>

<mosaic_0001>
module attributes {stable_mosaic.version = 11 : i64} {
  func.func @_decomp_flat_kernel(%arg0: i32, %arg1: memref<2x112xf32, #tpu.memory_space<vmem>>, %arg2: memref<2x112xf32, #tpu.memory_space<vmem>>, %arg3: memref<2x112xf32, #tpu.memory_space<vmem>>) attributes {dimension_semantics = [#tpu.dimension_semantics<parallel>], iteration_bounds = array<i64: 1>, scalar_prefetch = 0 : i64, scratch_operands = 0 : i64, tpu.core_type = #tpu.core_type<tc>, window_params = [{transform_indices = @transform_0, window_bounds = array<i64: 2, 112>}, {transform_indices = @transform_1, window_bounds = array<i64: 2, 112>}, {transform_indices = @transform_2, window_bounds = array<i64: 2, 112>}]} {
    %c0 = arith.constant 0 : index
    %c0_0 = arith.constant 0 : index
    %0 = vector.load %arg1[%c0, %c0_0] : memref<2x112xf32, #tpu.memory_space<vmem>>, vector<2x112xf32>
    %1 = vector.extract_strided_slice %0 {offsets = [0, 7], sizes = [2, 105], strides = [1, 1]} : vector<2x112xf32> to vector<2x105xf32>
    %2 = vector.extract_strided_slice %0 {offsets = [0, 105], sizes = [2, 7], strides = [1, 1]} : vector<2x112xf32> to vector<2x7xf32>
    %3 = tpu.concatenate %1, %2 in 1 : vector<2x105xf32>, vector<2x7xf32> -> vector<2x112xf32>
    %4 = vector.extract_strided_slice %0 {offsets = [0, 0], sizes = [2, 7], strides = [1, 1]} : vector<2x112xf32> to vector<2x7xf32>
    %5 = vector.extract_strided_slice %0 {offsets = [0, 0], sizes = [2, 105], strides = [1, 1]} : vector<2x112xf32> to vector<2x105xf32>
    %6 = tpu.concatenate %4, %5 in 1 : vector<2x7xf32>, vector<2x105xf32> -> vector<2x112xf32>
    %7 = arith.addf %0, %3 : vector<2x112xf32>
    %8 = arith.addf %7, %6 : vector<2x112xf32>
    %9 = vector.extract_strided_slice %3 {offsets = [0, 7], sizes = [2, 105], strides = [1, 1]} : vector<2x112xf32> to vector<2x105xf32>
    %10 = vector.extract_strided_slice %3 {offsets = [0, 105], sizes = [2, 7], strides = [1, 1]} : vector<2x112xf32> to vector<2x7xf32>
    %11 = tpu.concatenate %9, %10 in 1 : vector<2x105xf32>, vector<2x7xf32> -> vector<2x112xf32>
    %12 = vector.extract_strided_slice %6 {offsets = [0, 0], sizes = [2, 7], strides = [1, 1]} : vector<2x112xf32> to vector<2x7xf32>
    %13 = vector.extract_strided_slice %6 {offsets = [0, 0], sizes = [2, 105], strides = [1, 1]} : vector<2x112xf32> to vector<2x105xf32>
    %14 = tpu.concatenate %12, %13 in 1 : vector<2x7xf32>, vector<2x105xf32> -> vector<2x112xf32>
    %15 = arith.addf %8, %11 : vector<2x112xf32>
    %16 = arith.addf %15, %14 : vector<2x112xf32>
    %cst = arith.constant 2.000000e-01 : f32
    %17 = vector.broadcast %cst : f32 to vector<2x112xf32>
    %18 = arith.mulf %16, %17 : vector<2x112xf32>
    %c0_1 = arith.constant 0 : index
    %c0_2 = arith.constant 0 : index
    %19 = vector.load %arg3[%c0_1, %c0_2] : memref<2x112xf32, #tpu.memory_space<vmem>>, vector<2x112xf32>
    tpu.vector_store %arg3[%c0_1, %c0_2], %18 {strides = array<i32>} : memref<2x112xf32, #tpu.memory_space<vmem>>, vector<2x112xf32>,
    %20 = arith.subf %0, %18 : vector<2x112xf32>
    %c0_3 = arith.constant 0 : index
    %c0_4 = arith.constant 0 : index
    %21 = vector.load %arg2[%c0_3, %c0_4] : memref<2x112xf32, #tpu.memory_space<vmem>>, vector<2x112xf32>
    tpu.vector_store %arg2[%c0_3, %c0_4], %20 {strides = array<i32>} : memref<2x112xf32, #tpu.memory_space<vmem>>, vector<2x112xf32>,
    return
  }
  func.func @transform_0(%arg0: i32) -> (i32, i32) {
    %c0_i32 = arith.constant 0 : i32
    %c0_i32_0 = arith.constant 0 : i32
    return %arg0, %c0_i32 : i32, i32
  }
  func.func @transform_1(%arg0: i32) -> (i32, i32) {
    %c0_i32 = arith.constant 0 : i32
    %c0_i32_0 = arith.constant 0 : i32
    return %arg0, %c0_i32 : i32, i32
  }
  func.func @transform_2(%arg0: i32) -> (i32, i32) {
    %c0_i32 = arith.constant 0 : i32
    %c0_i32_0 = arith.constant 0 : i32
    return %arg0, %c0_i32 : i32, i32
  }
}

</mosaic_0001>

<bundles_post_ra>
// kernel: tpu_custom_call.1
= control target key start
LH: loop header
LB: loop body
LE: loop exit
PB: predicated region body
PF: predicated region fallthrough
CT: control target
= control target key end

     0   :  { %8 = vsyncpa [#allocation3], 0  ;;  %s186_s0 = inlined_call_operand.hbm [shape: f32[2,112], index: 0, kind: input, shape index: {}]   ;;  %s187_s1 = inlined_call_operand.hbm [shape: f32[2,112], index: 1, kind: output, shape index: {0}]   ;;  %s188_s2 = inlined_call_operand.hbm [shape: f32[2,112], index: 2, kind: output, shape index: {1}]  }
   0x1   :  { %9 = vsyncpa [#allocation4], 0 }
   0x2   :  { %10 = vsyncpa [#allocation7], 0  ;;  %s155_s9 = smov [#allocation2]  }
   0x3   :  { %s17_s10 = sshll.u32 %s155_s9, 4  ;;  %s18_s10 = int_to_ptr.vmem [resolvable:$true] %s17_s10 }
   0x4   :  { %s97_s11 = scalar_lea.vmem %s18_s10, 32  ;;  %p102_p1 = scmp.lt.s32.totalorder %s18_s10, %s18_s10 }
   0x5   :  { %p98_p0 = scmp.ne.s32.totalorder %s18_s10, %s97_s11  ;;  %p103_p2 = scmp.lt.s32.totalorder %s97_s11, %s97_s11 }
   0x7   :  { %p104_p3 = por %p103_p2, %p102_p1 }
   0x9   :  { %p105_p4 = pnand %p104_p3, %p98_p0 }
   0xb   :  { %108 = shalt.err (!%p105_p4)
}
   0xc   :  { %20 = dma.hbm_to_vmem [thread:$0]  %s186_s0, 32, %s18_s10, [#allocation3]  }
   0xd   :  { %149 = dma.done.wait [#allocation3], 32  }
   0xe   :  { %150 = vsyncadd [#allocation3], 4294967264  ;;  %v24_v0 = vld [vmem:[#allocation2] sm:$0x3]  ;;  %s156_s14 = smov 121   ;;  %s157_s15 = smov 7  }
   0xf   :  { %26 = vrot.lane.b32.xlu0 %v24_v0, %s156_s14  ;;  %vm29_vm0 = vcmask 859136   ;;  %vm34_vm1 = vcmask 56320   ;;  %s158_s0 = smov [#allocation6]   ;;  %vm51_vm2 = vcmask 910336   ;;  %s159_s17 = smov [#allocation5]  }
  0x10   :  { %s71_s16 = sshll.u32 %s158_s0, 4  ;;  %s61_s18 = sshll.u32 %s159_s17, 4  ;;  %s72_s16 = int_to_ptr.vmem [resolvable:$true] %s71_s16  ;;  %s62_s18 = int_to_ptr.vmem [resolvable:$true] %s61_s18 }
  0x11   :  { %s109_s19 = scalar_lea.vmem %s72_s16, 32  ;;  %p114_p6 = scmp.lt.s32.totalorder %s72_s16, %s72_s16 }
  0x12   :  { %p110_p5 = scmp.ne.s32.totalorder %s72_s16, %s109_s19  ;;  %p115_p7 = scmp.lt.s32.totalorder %s109_s19, %s109_s19 }
  0x13   :  { %31 = vrot.lane.b32.xlu0 %v24_v0, %s157_s15 }
  0x14   :  { %p116_p8 = por %p115_p7, %p114_p6 }
  0x16   :  { %p117_p9 = pnand %p116_p8, %p110_p5 }
  0x81   :  { %v27_v1 = vpop.permute.xlu0 %26 }
  0x82   :  { %v30_v2 = vsel %vm29_vm0, %v27_v1, %v24_v0 }
  0x83   :  { %39 = vrot.lane.b32.xlu1 %v30_v2, %s156_s14  ;;  %v36_v5 = vadd.f32 %v30_v2, %v24_v0 }
  0x85   :  { %v32_v3 = vpop.permute.xlu0 %31 }
  0x86   :  { %v35_v4 = vsel %vm34_vm1, %v24_v0, %v32_v3 }
  0x87   :  { %44 = vrot.lane.b32.xlu1 %v35_v4, %s157_s15  ;;  %v37_v8 = vadd.f32 %v36_v5, %v35_v4 }
  0xf5   :  { %v40_v6 = vpop.permute.xlu1 %39 }
  0xf6   :  { %v42_v7 = vsel %vm29_vm0, %v40_v6, %v30_v2 }
  0xf7   :  { %v48_v9 = vadd.f32 %v42_v7, %v37_v8 }
  0xf9   :  { %v45_v10 = vpop.permute.xlu1 %44 }
  0xfa   :  { %v47_v11 = vsel %vm34_vm1, %v35_v4, %v45_v10 }
  0xfb   :  { %v49_v12 = vadd.f32 %v48_v9, %v47_v11 }
  0xfd   :  { %v50_v13 = vmul.f32 0.2, %v49_v12 }
  0xff   :  { %v53_v14 = vsub.f32 %v24_v0, %v50_v13  ;;  %52 = vst.msk [vmem:[#allocation6] sm:$0x3] %vm51_vm2, %v50_v13 }
 0x100   :  { %120 = shalt.err (!%p117_p9)
}
 0x101   :  { %74 = dma.vmem_to_hbm [thread:$0]  %s72_s16, 32, %s188_s2, [#allocation7]   ;;  %54 = vst.msk [vmem:[#allocation5] sm:$0x3] %vm51_vm2, %v53_v14 }
 0x102   :  { %s129_s22 = scalar_lea.vmem %s62_s18, 32  ;;  %p134_p11 = scmp.lt.s32.totalorder %s62_s18, %s62_s18 }
 0x103   :  { %p130_p10 = scmp.ne.s32.totalorder %s62_s18, %s129_s22  ;;  %p135_p12 = scmp.lt.s32.totalorder %s129_s22, %s129_s22 }
 0x105   :  { %p136_p13 = por %p135_p12, %p134_p11 }
 0x107   :  { %p137_p0 = pnand %p136_p13, %p130_p10 }
 0x109   :  { %140 = shalt.err (!%p137_p0)
}
 0x10a   :  { %64 = dma.vmem_to_hbm [thread:$0]  %s62_s18, 32, %s187_s1, [#allocation4]  }
 0x10b   :  { %151 = dma.done.wait [#allocation4], 32  }
 0x10c   :  { %152 = vsyncadd [#allocation4], 4294967264 }
 0x10d   :  { %153 = dma.done.wait [#allocation7], 32  }
 0x10e   :  { %154 = vsyncadd [#allocation7], 4294967264 }
 0x10f   :  { %81 = vsyncpa [#allocation3], 1 }
 0x110   :  { %82 = vsyncpa [#allocation4], 1 }
 0x111   :  { %83 = vsyncpa [#allocation7], 1 }

</bundles_post_ra>
